<compile_context>
chip_gen: v7x
topology: tpu7x:2x2x1
jax: 0.10.0
libtpu: 0.0.40
codegen_flags: <defaults>
</compile_context>

<pallas_src>
import jax
import jax.numpy as jnp
from jax.experimental import pallas as pl
from jax.experimental.pallas import tpu as pltpu


def _round_up(n, m):
    return ((n + m - 1) // m) * m


def _uncertainty_kernel(x_ref, w1_ref, b1_ref, a_ref, w2_ref, b2_ref, o_ref):
    # Linear 1 on the MXU: bf16 operands, f32 accumulation (dominant work).
    h = jnp.dot(x_ref[...], w1_ref[...], preferred_element_type=jnp.float32)
    # Bias + PReLU (single shared parameter, scalar read from SMEM), all f32.
    h = h + b1_ref[...]
    a = a_ref[0]
    h = jnp.where(h >= 0.0, h, a * h)
    # Linear 2: tiny (TB, Hp) @ (Hp, 1) f32 matmul; keeps h in its natural
    # layout (no XLU transpose).  The (TB, 1) masked store is negligible.
    z = jnp.dot(h, w2_ref[...], preferred_element_type=jnp.float32) + b2_ref[0]
    # Softplus, matching torch.nn.Softplus (beta=1, threshold=20 -> linear).
    out = jnp.where(z > 20.0, z, jnp.log1p(jnp.exp(jnp.minimum(z, 20.0))))
    o_ref[...] = out.astype(o_ref.dtype)


def _choose_tb(B, D, Hp, x_bytes, w_bytes, tb_cap):
    """Batch tile: exact single tile for tiny B; otherwise a multiple of 128
    giving >= 2 grid steps, capped so the working set fits v7x's VMEM."""
    if B <= 128:
        return int(B)  # block dim == full array dim: always legal, no waste
    tb = min(tb_cap, _round_up(pl.cdiv(B, 2), 128))     # >= 2 grid steps
    budget = 40 * 1024 * 1024                           # headroom under v7x 64 MiB
    fixed = D * Hp * w_bytes + 4 * Hp * 4               # resident w1/b1/w2 (+slack)
    per_row = 2 * D * x_bytes + Hp * 4 + 2 * 4          # x dbl-buf + live h + out
    tb_fit = ((budget - fixed) // per_row // 128) * 128
    return int(max(128, min(tb, tb_fit)))


def uncertainty_forward(x, w1, b1, prelu_a, w2, b2, *, tb_cap=1024,
                        matmul_dtype=jnp.bfloat16):
    """x: (B, D); w1: (D, H); b1: (1, H); prelu_a: (1,1); w2: (H, 1); b2: (1,1)."""
    B, D = x.shape
    H = w1.shape[1]
    Hp = _round_up(H, 128)

    # Pad the hidden width to a full lane multiple.  Zero columns are inert:
    # 0 + 0 bias -> PReLU(0) = 0 -> contributes exactly 0 to the second linear.
    if Hp != H:
        w1 = jnp.pad(w1, ((0, 0), (0, Hp - H)))
        b1 = jnp.pad(b1, ((0, 0), (0, Hp - H)))
        w2 = jnp.pad(w2, ((0, Hp - H), (0, 0)))

    # bf16 operands for the first (dominant) matmul only; elementwise stays f32.
    x_mm = x.astype(matmul_dtype)
    w1_mm = w1.astype(matmul_dtype)
    b1_f = b1.astype(jnp.float32)            # (1, Hp)
    w2_col = w2.astype(jnp.float32)          # (Hp, 1)
    a_s = prelu_a.reshape(1).astype(jnp.float32)   # SMEM scalar
    b2_s = b2.reshape(1).astype(jnp.float32)       # SMEM scalar

    itemsize = jnp.dtype(matmul_dtype).itemsize
    TB = _choose_tb(B, D, Hp, itemsize, itemsize, tb_cap)
    grid = (pl.cdiv(B, TB),)

    out = pl.pallas_call(
        _uncertainty_kernel,
        out_shape=jax.ShapeDtypeStruct((B, 1), jnp.float32),
        grid=grid,
        in_specs=[
            pl.BlockSpec((TB, D), lambda i: (i, 0)),             # x: pipelined tiles
            pl.BlockSpec(memory_space=pltpu.MemorySpace.VMEM),   # w1: resident, 1 copy
            pl.BlockSpec(memory_space=pltpu.MemorySpace.VMEM),   # b1: resident
            pl.BlockSpec(memory_space=pltpu.MemorySpace.SMEM),   # prelu_a scalar
            pl.BlockSpec(memory_space=pltpu.MemorySpace.VMEM),   # w2 column: resident
            pl.BlockSpec(memory_space=pltpu.MemorySpace.SMEM),   # b2 scalar
        ],
        out_specs=pl.BlockSpec((TB, 1), lambda i: (i, 0)),
        compiler_params=pltpu.CompilerParams(
            dimension_semantics=("parallel",),
            vmem_limit_bytes=48 * 1024 * 1024,
        ),
    )(x_mm, w1_mm, b1_f, a_s, w2_col, b2_s)
    return out


def init_params(key, in_dim):
    """Deterministic synthetic init (shapes match the PyTorch module)."""
    hid = in_dim // 2
    k1, k2, k3, k4 = jax.random.split(key, 4)
    lim1 = 1.0 / jnp.sqrt(in_dim)
    w1 = jax.random.uniform(k1, (in_dim, hid), jnp.float32, -lim1, lim1)
    b1 = jax.random.uniform(k2, (1, hid), jnp.float32, -lim1, lim1)
    prelu_a = jnp.full((1, 1), 0.25, jnp.float32)   # PReLU default single param
    lim2 = 1.0 / jnp.sqrt(hid)
    w2 = jax.random.uniform(k3, (hid, 1), jnp.float32, -lim2, lim2)
    b2 = jax.random.uniform(k4, (1, 1), jnp.float32, -lim2, lim2)
    return w1, b1, prelu_a, w2, b2


def reference_forward(x, w1, b1, prelu_a, w2, b2, matmul_dtype=jnp.bfloat16):
    """Pure-JAX reference mirroring the kernel's bf16 first matmul."""
    h = jnp.dot(x.astype(matmul_dtype), w1.astype(matmul_dtype),
                preferred_element_type=jnp.float32) + b1
    h = jnp.where(h >= 0.0, h, prelu_a[0, 0] * h)
    z = jnp.dot(h, w2.astype(jnp.float32),
                preferred_element_type=jnp.float32) + b2
    return jnp.where(z > 20.0, z, jnp.log1p(jnp.exp(jnp.minimum(z, 20.0))))


if __name__ == "__main__":
    key = jax.random.PRNGKey(0)
    kx, kp = jax.random.split(key)

    batch, in_dim = 8, 32
    x = jax.random.normal(kx, (batch, in_dim), jnp.float32)
    params = init_params(kp, in_dim)

    out = uncertainty_forward(x, *params)
    jax.block_until_ready(out)
    ref = reference_forward(x, *params)
    assert out.shape == (batch, 1)
    assert jnp.allclose(out, ref, atol=1e-4, rtol=1e-4)

    # Multi-tile grid + partial (boundary) tail block: B=200, TB=128 -> 2 steps.
    batch2 = 200
    x2 = jax.random.normal(jax.random.PRNGKey(1), (batch2, in_dim), jnp.float32)
    out2 = uncertainty_forward(x2, *params)
    jax.block_until_ready(out2)
    ref2 = reference_forward(x2, *params)
    assert out2.shape == (batch2, 1)
    assert jnp.allclose(out2, ref2, atol=1e-4, rtol=1e-4)

    print("KERNEL_OK")
</pallas_src>

<mosaic_0001>
module attributes {stable_mosaic.version = 11 : i64} {
  func.func @_uncertainty_kernel(%arg0: i32, %arg1: memref<8x32xbf16, #tpu.memory_space<vmem>>, %arg2: memref<32x128xbf16, #tpu.memory_space<vmem>>, %arg3: memref<1x128xf32, #tpu.memory_space<vmem>>, %arg4: memref<1xf32, #tpu.memory_space<smem>>, %arg5: memref<128x1xf32, #tpu.memory_space<vmem>>, %arg6: memref<1xf32, #tpu.memory_space<smem>>, %arg7: memref<8x1xf32, #tpu.memory_space<vmem>>) attributes {dimension_semantics = [#tpu.dimension_semantics<parallel>], iteration_bounds = array<i64: 1>, scalar_prefetch = 0 : i64, scratch_operands = 0 : i64, tpu.core_type = #tpu.core_type<tc>, window_params = [{transform_indices = @transform_0, window_bounds = array<i64: 8, 32>}, {pipeline_mode = #tpu.pipeline_mode<synchronous>, transform_indices = @transform_1, window_bounds = array<i64: 32, 128>}, {pipeline_mode = #tpu.pipeline_mode<synchronous>, transform_indices = @transform_2, window_bounds = array<i64: 1, 128>}, {transform_indices = @transform_3, window_bounds = array<i64: 1>}, {pipeline_mode = #tpu.pipeline_mode<synchronous>, transform_indices = @transform_4, window_bounds = array<i64: 128, 1>}, {transform_indices = @transform_5, window_bounds = array<i64: 1>}, {transform_indices = @transform_6, window_bounds = array<i64: 8, 1>}]} {
    %c0 = arith.constant 0 : index
    %c0_0 = arith.constant 0 : index
    %0 = vector.load %arg1[%c0, %c0_0] : memref<8x32xbf16, #tpu.memory_space<vmem>>, vector<8x32xbf16>
    %c0_1 = arith.constant 0 : index
    %c0_2 = arith.constant 0 : index
    %1 = vector.load %arg2[%c0_1, %c0_2] : memref<32x128xbf16, #tpu.memory_space<vmem>>, vector<32x128xbf16>
    %cst = arith.constant dense<0.000000e+00> : vector<8x128xf32>
    %2 = tpu.matmul %0, %1, %cst {dimension_numbers = #tpu.dot_dimension_numbers<[1], [0], [0], [1], [0, 0, 1, 1], [], []>} : vector<8x32xbf16>, vector<32x128xbf16>, vector<8x128xf32> -> vector<8x128xf32>
    %c0_3 = arith.constant 0 : index
    %c0_4 = arith.constant 0 : index
    %3 = vector.load %arg3[%c0_3, %c0_4] : memref<1x128xf32, #tpu.memory_space<vmem>>, vector<1x128xf32>
    %4 = vector.broadcast %3 : vector<1x128xf32> to vector<8x128xf32>
    %5 = arith.addf %2, %4 : vector<8x128xf32>
    %c0_5 = arith.constant 0 : index
    %6 = memref.load %arg4[%c0_5] : memref<1xf32, #tpu.memory_space<smem>>
    %cst_6 = arith.constant 0.000000e+00 : f32
    %7 = vector.broadcast %cst_6 : f32 to vector<8x128xf32>
    %8 = arith.cmpf oge, %5, %7 : vector<8x128xf32>
    %9 = vector.broadcast %6 : f32 to vector<8x128xf32>
    %10 = arith.mulf %9, %5 : vector<8x128xf32>
    %11 = arith.select %8, %5, %10 : vector<8x128xi1>, vector<8x128xf32>
    %c0_7 = arith.constant 0 : index
    %c0_8 = arith.constant 0 : index
    %12 = vector.load %arg5[%c0_7, %c0_8] : memref<128x1xf32, #tpu.memory_space<vmem>>, vector<128x1xf32>
    %cst_9 = arith.constant dense<0.000000e+00> : vector<8x1xf32>
    %13 = tpu.matmul %11, %12, %cst_9 {dimension_numbers = #tpu.dot_dimension_numbers<[1], [0], [0], [1], [0, 0, 1, 1], [], []>} : vector<8x128xf32>, vector<128x1xf32>, vector<8x1xf32> -> vector<8x1xf32>
    %c0_10 = arith.constant 0 : index
    %14 = memref.load %arg6[%c0_10] : memref<1xf32, #tpu.memory_space<smem>>
    %15 = vector.broadcast %14 : f32 to vector<8x1xf32>
    %16 = arith.addf %13, %15 : vector<8x1xf32>
    %cst_11 = arith.constant 2.000000e+01 : f32
    %17 = vector.broadcast %cst_11 : f32 to vector<8x1xf32>
    %18 = arith.cmpf ogt, %16, %17 : vector<8x1xf32>
    %cst_12 = arith.constant 2.000000e+01 : f32
    %19 = vector.broadcast %cst_12 : f32 to vector<8x1xf32>
    %20 = arith.minimumf %16, %19 : vector<8x1xf32>
    %21 = math.exp %20 : vector<8x1xf32>
    %22 = math.log1p %21 : vector<8x1xf32>
    %23 = arith.select %18, %16, %22 : vector<8x1xi1>, vector<8x1xf32>
    %c0_13 = arith.constant 0 : index
    %c0_14 = arith.constant 0 : index
    %24 = vector.load %arg7[%c0_13, %c0_14] : memref<8x1xf32, #tpu.memory_space<vmem>>, vector<8x1xf32>
    tpu.vector_store %arg7[%c0_13, %c0_14], %23 {strides = array<i32>} : memref<8x1xf32, #tpu.memory_space<vmem>>, vector<8x1xf32>,
    return
  }
  func.func @transform_0(%arg0: i32) -> (i32, i32) {
    %c0_i32 = arith.constant 0 : i32
    %c0_i32_0 = arith.constant 0 : i32
    return %arg0, %c0_i32 : i32, i32
  }
  func.func @transform_1(%arg0: i32) -> (i32, i32) {
    %c0_i32 = arith.constant 0 : i32
    %c0_i32_0 = arith.constant 0 : i32
    %c0_i32_1 = arith.constant 0 : i32
    return %c0_i32, %c0_i32_0 : i32, i32
  }
  func.func @transform_2(%arg0: i32) -> (i32, i32) {
    %c0_i32 = arith.constant 0 : i32
    %c0_i32_0 = arith.constant 0 : i32
    %c0_i32_1 = arith.constant 0 : i32
    return %c0_i32, %c0_i32_0 : i32, i32
  }
  func.func @transform_3(%arg0: i32) -> i32 {
    %c0_i32 = arith.constant 0 : i32
    %c0_i32_0 = arith.constant 0 : i32
    return %c0_i32 : i32
  }
  func.func @transform_4(%arg0: i32) -> (i32, i32) {
    %c0_i32 = arith.constant 0 : i32
    %c0_i32_0 = arith.constant 0 : i32
    %c0_i32_1 = arith.constant 0 : i32
    return %c0_i32, %c0_i32_0 : i32, i32
  }
  func.func @transform_5(%arg0: i32) -> i32 {
    %c0_i32 = arith.constant 0 : i32
    %c0_i32_0 = arith.constant 0 : i32
    return %c0_i32 : i32
  }
  func.func @transform_6(%arg0: i32) -> (i32, i32) {
    %c0_i32 = arith.constant 0 : i32
    %c0_i32_0 = arith.constant 0 : i32
    return %arg0, %c0_i32 : i32, i32
  }
}

</mosaic_0001>

<bundles_post_ra>
// kernel: tpu_custom_call.1
= control target key start
LH: loop header
LB: loop body
LE: loop exit
PB: predicated region body
PF: predicated region fallthrough
CT: control target
= control target key end

     0   :  { %v307_v0 = vmov 0.0   ;;  %vm308_vm0 = vmmov 0   ;;  %v309_v2 = vmov 0.0|0.0   ;;  %vm50_vm1 = vcmask 261120   ;;  %s414_s1 = inlined_call_operand.vmem [shape: bf16[32,128], index: 1, kind: input, shape index: {}]   ;;  %s415_s4 = inlined_call_operand.vmem [shape: f32[128,1], index: 4, kind: input, shape index: {}]   ;;  %s416_s0 = inlined_call_operand.vmem [shape: bf16[8,32], index: 0, kind: input, shape index: {}]   ;;  %s417_s2 = inlined_call_operand.vmem [shape: f32[1,128], index: 2, kind: input, shape index: {}]   ;;  %s418_s3 = inlined_call_operand.<no memory space> [shape: f32[1], index: 3, kind: input, shape index: {}]   ;;  %s419_s5 = inlined_call_operand.<no memory space> [shape: f32[1], index: 5, kind: input, shape index: {}]   ;;  %s420_s6 = inlined_call_operand.vmem [shape: f32[8,1], index: 6, kind: output, shape index: {}]  }
   0x1   :  { %231 = vmatprep.subr.bf16.mxu0 %v307_v0  ;;  %v301_v1 = vld [vmem:[%s414_s1] sm:$0xff]   ;;  %235 = vmatprep.mubr.msk.bf16.mxu0 %vm308_vm0, %v307_v0  ;;  %v302_v3 = vld [vmem:[%s414_s1 + $0x8] sm:$0xff]   ;;  %v101_v7 = vld [vmem:[%s415_s4 + $0x10] sm:$0xff]  ;;  %v96_v31 = vstv %s418_s3  ;;  %vm201_vm4 = vcmask 7168  }
   0x2   :  { %274 = vmatprep.subr.bf16.mxu1 %v309_v2  ;;  %271 = vmatprep.mubr.msk.f32.mxu1 %vm308_vm0, %v307_v0  ;;  %v99_v4 = vld [vmem:[%s415_s4] sm:$0xff]  ;;  %v100_v5 = vld [vmem:[%s415_s4 + $0x8] sm:$0xff]  ;;  %v102_v8 = vld [vmem:[%s415_s4 + $0x18] sm:$0xff]  ;;  %v116_v38 = vstv %s419_s5 }
   0x3   :  { %232 = vmatpush3.bf16.msra.mxu0 %v301_v1  ;;  %v275_v6 = vpack.c.bf16 %v100_v5, %v99_v4  ;;  %v278_v9 = vpack.c.bf16 %v102_v8, %v101_v7  ;;  %v26_v10 = vld [vmem:[%s416_s0] sm:$0xf]  ;;  %v104_v12 = vld [vmem:[%s415_s4 + $0x28] sm:$0xff]  ;;  %v105_v14 = vld [vmem:[%s415_s4 + $0x30] sm:$0xff] }
   0x4   :  { %233 = vmatprep.subr.bf16.mxu0 %v307_v0  ;;  %v103_v11 = vld [vmem:[%s415_s4 + $0x20] sm:$0xff]  ;;  %v106_v15 = vld [vmem:[%s415_s4 + $0x38] sm:$0xff]  ;;  %v108_v18 = vld [vmem:[%s415_s4 + $0x48] sm:$0xff] }
   0x5   :  { %276 = vmatpush3.bf16.msra.mxu1 %v275_v6  ;;  %v281_v13 = vpack.c.bf16 %v104_v12, %v103_v11  ;;  %v284_v16 = vpack.c.bf16 %v106_v15, %v105_v14  ;;  %v107_v17 = vld [vmem:[%s415_s4 + $0x40] sm:$0xff]  ;;  %v109_v20 = vld [vmem:[%s415_s4 + $0x50] sm:$0xff]  ;;  %v110_v21 = vld [vmem:[%s415_s4 + $0x58] sm:$0xff] }
   0x6   :  { %277 = vmatprep.subr.bf16.mxu1 %v309_v2  ;;  %v287_v19 = vpack.c.bf16 %v108_v18, %v107_v17  ;;  %v290_v22 = vpack.c.bf16 %v110_v21, %v109_v20  ;;  %v111_v23 = vld [vmem:[%s415_s4 + $0x60] sm:$0xff]  ;;  %v112_v24 = vld [vmem:[%s415_s4 + $0x68] sm:$0xff]  ;;  %v113_v26 = vld [vmem:[%s415_s4 + $0x70] sm:$0xff] }
   0x7   :  { %234 = vmatpush3.bf16.msra.mxu0 %v302_v3  ;;  %v293_v25 = vpack.c.bf16 %v112_v24, %v111_v23  ;;  %v114_v27 = vld [vmem:[%s415_s4 + $0x78] sm:$0xff]  ;;  %v207_v29 = vld [vmem:[%s417_s2] ss:$0 sm:$0xff] }
   0x8   :  { %v296_v28 = vpack.c.bf16 %v114_v27, %v113_v26 }
   0x9   :  { %279 = vmatpush3.bf16.msra.mxu1 %v278_v9 }
   0xa   :  { %236 = vmatmul.mubr.msk.bf16.vlgmr.msra.gmra.mrb[0].mxu0 %vm50_vm1, %v26_v10  ;;  %280 = vmatprep.subr.bf16.mxu1 %v309_v2 }
   0xd   :  { %282 = vmatpush3.bf16.msra.mxu1 %v281_v13 }
   0xe   :  { %283 = vmatprep.subr.bf16.mxu1 %v309_v2 }
  0x11   :  { %285 = vmatpush3.bf16.msra.mxu1 %v284_v16 }
  0x12   :  { %286 = vmatprep.subr.bf16.mxu1 %v309_v2 }
  0x15   :  { %288 = vmatpush3.bf16.msra.mxu1 %v287_v19 }
  0x16   :  { %289 = vmatprep.subr.bf16.mxu1 %v309_v2 }
  0x19   :  { %291 = vmatpush3.bf16.msra.mxu1 %v290_v22 }
  0x1a   :  { %292 = vmatprep.subr.bf16.mxu1 %v309_v2 }
  0x1d   :  { %294 = vmatpush3.bf16.msra.mxu1 %v293_v25 }
  0x1e   :  { %295 = vmatprep.subr.bf16.mxu1 %v309_v2 }
  0x21   :  { %297 = vmatpush3.bf16.msra.mxu1 %v296_v28 }
  0xdd   :  { %v88_v30 = vpop.f32.mrb[0].mxu0 }
  0xde   :  { %v89_v32 = vadd.f32 %v207_v29, %v88_v30  ;;  %v237_v33 = vpop.f32.mrb[1].mxu0 }
  0xdf   :  { %v91_v34 = vpop.f32.mrb[2].mxu0 }
  0xe0   :  { %v97_v35 = vmul.f32 %v96_v31, %v89_v32  ;;  %v238_v36 = vpop.f32.mrb[3].mxu0  ;;  %vm95_vm2 = vcmp.ge.f32.partialorder %v89_v32, 0.0 }
  0xe2   :  { %v98_v37 = vsel %vm95_vm2, %v89_v32, %v97_v35 }
  0xe3   :  { %272 = vmatmul.mubr.f32.vlgmr.msra.gmra.mrb[0].mxu1 %v98_v37 }
 0x1b6   :  { %v183_v39 = vpop.f32.mrb[0].mxu1 }
 0x1b7   :  { %v184_v40 = vadd.f32 %v183_v39, %v116_v38  ;;  %v273_v41 = vpop.f32.mrb[1].mxu1 }
 0x1b9   :  { %v188_v42 = vmin.f32 %v184_v40, 20.0  ;;  %vm187_vm5 = vcmp.gt.f32.partialorder %v184_v40, 20.0 }
 0x1bb   :  { %v189_v43 = vmul.f32 1.442695, %v188_v42 }
 0x1bd   :  { %303 = vpow2.f32 %v189_v43 }
 0x1c7   :  { %v304_v44 = vpop.eup %303 }
 0x1c8   :  { %v191_v45 = vadd.f32 1.0, %v304_v44  ;;  %v194_v46 = vmul.f32 -0.5, %v304_v44  ;;  %v197_v48 = vand.u32 2147483647, %v304_v44 }
 0x1ca   :  { %305 = vlog2.f32 %v191_v45  ;;  %v195_v47 = vadd.f32 1.0, %v194_v46  ;;  %vm198_vm3 = vcmp.lt.f32.partialorder %v197_v48, 0.0004427343 }
 0x1cc   :  { %v196_v51 = vmul.f32 %v304_v44, %v195_v47 }
 0x1d4   :  { %v306_v49 = vpop.eup %305 }
 0x1d5   :  { %v193_v50 = vmul.f32 0.6931472, %v306_v49 }
 0x1d7   :  { %v199_v52 = vsel %vm198_vm3, %v196_v51, %v193_v50 }
 0x1d8   :  { %v200_v53 = vsel %vm187_vm5, %v184_v40, %v199_v52 }
 0x1d9   :  { %202 = vst.msk [vmem:[%s420_s6] sm:$0xff] %vm201_vm4, %v200_v53 }

</bundles_post_ra>
